<compile_context>
chip_gen: v7x
topology: tpu7x:2x2x1
jax: 0.10.0
libtpu: 0.0.40
codegen_flags: <defaults>
</compile_context>

<pallas_src>
import functools
import math

import jax
import jax.numpy as jnp
import numpy as np
from jax import lax
from jax.experimental import pallas as pl
from jax.experimental.pallas import tpu as pltpu


# ----------------------------------------------------------------------------
# Fused attention kernel: one grid step == one batch element.
# ----------------------------------------------------------------------------
def _fused_attention_kernel(x_ref, wqkv_ref, bqkv_ref, wout_ref, bout_ref,
                            o_ref, *, num_heads, scale):
    """
    x_ref    : (1, N, H)   tokens for this batch element
    wqkv_ref : (H, 3H)     [Wq^T | Wk^T | Wv^T]   (pre-transposed host-side)
    bqkv_ref : (1, 3H)     [bq | bk | bv]
    wout_ref : (H, H)      Wout^T
    bout_ref : (1, H)      bout
    o_ref    : (1, N, H)
    """
    _, N, H = x_ref.shape
    hs = H // num_heads

    x = x_ref[0].astype(jnp.float32)                         # (N, H)
    w_qkv = wqkv_ref[...].astype(jnp.float32)                # (H, 3H)
    w_out = wout_ref[...].astype(jnp.float32)                # (H, H)

    # Fused QKV projection (single MXU matmul) with bias epilogue.
    qkv = jnp.dot(x, w_qkv, preferred_element_type=jnp.float32) + bqkv_ref[...]

    # Per-head scaled-dot-product attention.  The output projection is fused
    # head-wise (ctx_h @ Wout^T[h*hs:(h+1)*hs, :]) so no concat / extra HBM
    # pass is needed.
    acc = jnp.zeros((N, H), jnp.float32)
    for h in range(num_heads):                               # static unroll
        qh = qkv[:, h * hs:(h + 1) * hs] * scale             # (N, hs)
        kh = qkv[:, H + h * hs:H + (h + 1) * hs]             # (N, hs)
        vh = qkv[:, 2 * H + h * hs:2 * H + (h + 1) * hs]     # (N, hs)

        # scores = q @ k^T  (contract last dims; no explicit transpose)
        s = lax.dot_general(qh, kh, (((1,), (1,)), ((), ())),
                            preferred_element_type=jnp.float32)   # (N, N)

        # numerically stable softmax
        m = jnp.max(s, axis=-1, keepdims=True)
        e = jnp.exp(s - m)
        denom = jnp.sum(e, axis=-1, keepdims=True)
        p = e * pl.reciprocal(denom, approx=False)

        ctx_h = jnp.dot(p, vh, preferred_element_type=jnp.float32)   # (N, hs)
        acc += jnp.dot(ctx_h, w_out[h * hs:(h + 1) * hs, :],
                       preferred_element_type=jnp.float32)           # (N, H)

    out = acc + bout_ref[...]
    o_ref[0] = out.astype(o_ref.dtype)


# ----------------------------------------------------------------------------
# Wrapper (PyTorch Linear layout:  y = x @ W^T + b,  W: (out, in))
# ----------------------------------------------------------------------------
@functools.partial(jax.jit, static_argnames=("num_heads",))
def attention_forward(params, hidden_states, num_heads):
    B, N, H = hidden_states.shape
    assert H % num_heads == 0
    hs = H // num_heads

    # One-time host-side weight re-packing (tiny, done once under jit).
    wqkv = jnp.concatenate([params['query']['w'].T,
                            params['key']['w'].T,
                            params['value']['w'].T], axis=1)          # (H, 3H)
    bqkv = jnp.concatenate([params['query']['b'],
                            params['key']['b'],
                            params['value']['b']])[None, :]           # (1, 3H)
    wout = params['out']['w'].T                                       # (H, H)
    bout = params['out']['b'][None, :]                                # (1, H)

    kernel = functools.partial(_fused_attention_kernel,
                               num_heads=num_heads,
                               scale=1.0 / math.sqrt(hs))

    out = pl.pallas_call(
        kernel,
        out_shape=jax.ShapeDtypeStruct((B, N, H), hidden_states.dtype),
        grid_spec=pltpu.PrefetchScalarGridSpec(
            num_scalar_prefetch=0,
            grid=(B,),
            in_specs=[pl.BlockSpec((1, N, H), lambda b: (b, 0, 0)),
                      pl.BlockSpec((H, 3 * H), lambda b: (0, 0)),
                      pl.BlockSpec((1, 3 * H), lambda b: (0, 0)),
                      pl.BlockSpec((H, H), lambda b: (0, 0)),
                      pl.BlockSpec((1, H), lambda b: (0, 0))],
            out_specs=pl.BlockSpec((1, N, H), lambda b: (b, 0, 0))),
        compiler_params=pltpu.CompilerParams(
            dimension_semantics=("parallel",)),
    )(hidden_states, wqkv, bqkv, wout, bout)

    # The PyTorch module returns (attention_output, weights); weights is None
    # when vis=False.
    return out, None


# ----------------------------------------------------------------------------
# Pure-JAX reference (mirrors the PyTorch forward exactly) for a sanity check.
# ----------------------------------------------------------------------------
def attention_reference(params, x, num_heads):
    B, N, H = x.shape
    hs = H // num_heads
    hp = lax.Precision.HIGHEST

    def lin(p, t):
        return jnp.einsum('bnh,oh->bno', t, p['w'], precision=hp) + p['b']

    def split(t):
        return t.reshape(B, N, num_heads, hs).transpose(0, 2, 1, 3)

    q = split(lin(params['query'], x))
    k = split(lin(params['key'], x))
    v = split(lin(params['value'], x))
    s = jnp.einsum('bhqd,bhkd->bhqk', q, k, precision=hp) / math.sqrt(hs)
    p = jax.nn.softmax(s, axis=-1)
    ctx = jnp.einsum('bhqk,bhkd->bhqd', p, v, precision=hp)
    ctx = ctx.transpose(0, 2, 1, 3).reshape(B, N, H)
    return jnp.einsum('bnh,oh->bno', ctx, params['out']['w'],
                      precision=hp) + params['out']['b']


# ----------------------------------------------------------------------------
if __name__ == "__main__":
    B, N, H, num_heads = 2, 16, 64, 4

    key = jax.random.PRNGKey(0)
    kq, kk, kv, ko, kb, kx = jax.random.split(key, 6)
    wscale = 1.0 / math.sqrt(H)

    def init_linear(k):
        k1, k2 = jax.random.split(k)
        return {'w': wscale * jax.random.normal(k1, (H, H), jnp.float32),
                'b': 0.1 * jax.random.normal(k2, (H,), jnp.float32)}

    params = {'query': init_linear(kq),
              'key': init_linear(kk),
              'value': init_linear(kv),
              'out': init_linear(ko)}

    hidden_states = jax.random.normal(kx, (B, N, H), jnp.float32)

    out, weights = attention_forward(params, hidden_states, num_heads)
    out = jax.block_until_ready(out)

    assert out.shape == (B, N, H)
    assert bool(jnp.all(jnp.isfinite(out)))

    ref = attention_reference(params, hidden_states, num_heads)
    np.testing.assert_allclose(np.asarray(out), np.asarray(ref),
                               rtol=1e-2, atol=1e-2)

    print("KERNEL_OK")
</pallas_src>

<mosaic_0001>
module attributes {stable_mosaic.version = 11 : i64} {
  func.func @_fused_attention_kernel(%arg0: i32, %arg1: memref<1x16x64xf32, #tpu.memory_space<vmem>>, %arg2: memref<64x192xf32, #tpu.memory_space<vmem>>, %arg3: memref<1x192xf32, #tpu.memory_space<vmem>>, %arg4: memref<64x64xf32, #tpu.memory_space<vmem>>, %arg5: memref<1x64xf32, #tpu.memory_space<vmem>>, %arg6: memref<1x16x64xf32, #tpu.memory_space<vmem>>) attributes {dimension_semantics = [#tpu.dimension_semantics<parallel>], iteration_bounds = array<i64: 2>, scalar_prefetch = 0 : i64, scratch_operands = 0 : i64, tpu.core_type = #tpu.core_type<tc>, window_params = [{transform_indices = @transform_0, window_bounds = array<i64: 1, 16, 64>}, {pipeline_mode = #tpu.pipeline_mode<synchronous>, transform_indices = @transform_1, window_bounds = array<i64: 64, 192>}, {pipeline_mode = #tpu.pipeline_mode<synchronous>, transform_indices = @transform_2, window_bounds = array<i64: 1, 192>}, {pipeline_mode = #tpu.pipeline_mode<synchronous>, transform_indices = @transform_3, window_bounds = array<i64: 64, 64>}, {pipeline_mode = #tpu.pipeline_mode<synchronous>, transform_indices = @transform_4, window_bounds = array<i64: 1, 64>}, {transform_indices = @transform_5, window_bounds = array<i64: 1, 16, 64>}]} {
    %c0 = arith.constant 0 : index
    %c0_0 = arith.constant 0 : index
    %c0_1 = arith.constant 0 : index
    %0 = vector.load %arg1[%c0, %c0_0, %c0_1] : memref<1x16x64xf32, #tpu.memory_space<vmem>>, vector<1x16x64xf32>
    %1 = vector.shape_cast %0 : vector<1x16x64xf32> to vector<16x64xf32>
    %c0_2 = arith.constant 0 : index
    %c0_3 = arith.constant 0 : index
    %2 = vector.load %arg2[%c0_2, %c0_3] : memref<64x192xf32, #tpu.memory_space<vmem>>, vector<64x192xf32>
    %c0_4 = arith.constant 0 : index
    %c0_5 = arith.constant 0 : index
    %3 = vector.load %arg4[%c0_4, %c0_5] : memref<64x64xf32, #tpu.memory_space<vmem>>, vector<64x64xf32>
    %cst = arith.constant dense<0.000000e+00> : vector<16x192xf32>
    %4 = tpu.matmul %1, %2, %cst {dimension_numbers = #tpu.dot_dimension_numbers<[1], [0], [0], [1], [0, 0, 1, 1], [], []>} : vector<16x64xf32>, vector<64x192xf32>, vector<16x192xf32> -> vector<16x192xf32>
    %c0_6 = arith.constant 0 : index
    %c0_7 = arith.constant 0 : index
    %5 = vector.load %arg3[%c0_6, %c0_7] : memref<1x192xf32, #tpu.memory_space<vmem>>, vector<1x192xf32>
    %6 = vector.broadcast %5 : vector<1x192xf32> to vector<16x192xf32>
    %7 = arith.addf %4, %6 : vector<16x192xf32>
    %cst_8 = arith.constant 0.000000e+00 : f32
    %8 = vector.broadcast %cst_8 : f32 to vector<16x64xf32>
    %9 = vector.extract_strided_slice %7 {offsets = [0, 0], sizes = [16, 16], strides = [1, 1]} : vector<16x192xf32> to vector<16x16xf32>
    %cst_9 = arith.constant 2.500000e-01 : f32
    %10 = vector.broadcast %cst_9 : f32 to vector<16x16xf32>
    %11 = arith.mulf %9, %10 : vector<16x16xf32>
    %12 = vector.extract_strided_slice %7 {offsets = [0, 64], sizes = [16, 16], strides = [1, 1]} : vector<16x192xf32> to vector<16x16xf32>
    %13 = vector.extract_strided_slice %7 {offsets = [0, 128], sizes = [16, 16], strides = [1, 1]} : vector<16x192xf32> to vector<16x16xf32>
    %cst_10 = arith.constant dense<0.000000e+00> : vector<16x16xf32>
    %14 = tpu.matmul %11, %12, %cst_10 {dimension_numbers = #tpu.dot_dimension_numbers<[1], [1], [0], [0], [0, 0, 1, 0], [], []>} : vector<16x16xf32>, vector<16x16xf32>, vector<16x16xf32> -> vector<16x16xf32>
    %cst_11 = arith.constant dense<0xFF800000> : vector<16xf32>
    %15 = vector.multi_reduction <maximumf>, %14, %cst_11 [1] : vector<16x16xf32> to vector<16xf32>
    %16 = vector.shape_cast %15 : vector<16xf32> to vector<16x1xf32>
    %17 = vector.broadcast %16 : vector<16x1xf32> to vector<16x16xf32>
    %18 = arith.subf %14, %17 : vector<16x16xf32>
    %19 = math.exp %18 : vector<16x16xf32>
    %cst_12 = arith.constant dense<0.000000e+00> : vector<16xf32>
    %20 = vector.multi_reduction <add>, %19, %cst_12 [1] : vector<16x16xf32> to vector<16xf32>
    %21 = vector.shape_cast %20 : vector<16xf32> to vector<16x1xf32>
    %22 = tpu.reciprocal %21 : vector<16x1xf32> -> vector<16x1xf32>
    %23 = vector.broadcast %22 : vector<16x1xf32> to vector<16x16xf32>
    %24 = arith.mulf %19, %23 : vector<16x16xf32>
    %cst_13 = arith.constant dense<0.000000e+00> : vector<16x16xf32>
    %25 = tpu.matmul %24, %13, %cst_13 {dimension_numbers = #tpu.dot_dimension_numbers<[1], [0], [0], [1], [0, 0, 1, 1], [], []>} : vector<16x16xf32>, vector<16x16xf32>, vector<16x16xf32> -> vector<16x16xf32>
    %26 = vector.extract_strided_slice %3 {offsets = [0, 0], sizes = [16, 64], strides = [1, 1]} : vector<64x64xf32> to vector<16x64xf32>
    %cst_14 = arith.constant dense<0.000000e+00> : vector<16x64xf32>
    %27 = tpu.matmul %25, %26, %cst_14 {dimension_numbers = #tpu.dot_dimension_numbers<[1], [0], [0], [1], [0, 0, 1, 1], [], []>} : vector<16x16xf32>, vector<16x64xf32>, vector<16x64xf32> -> vector<16x64xf32>
    %28 = arith.addf %8, %27 : vector<16x64xf32>
    %29 = vector.extract_strided_slice %7 {offsets = [0, 16], sizes = [16, 16], strides = [1, 1]} : vector<16x192xf32> to vector<16x16xf32>
    %cst_15 = arith.constant 2.500000e-01 : f32
    %30 = vector.broadcast %cst_15 : f32 to vector<16x16xf32>
    %31 = arith.mulf %29, %30 : vector<16x16xf32>
    %32 = vector.extract_strided_slice %7 {offsets = [0, 80], sizes = [16, 16], strides = [1, 1]} : vector<16x192xf32> to vector<16x16xf32>
    %33 = vector.extract_strided_slice %7 {offsets = [0, 144], sizes = [16, 16], strides = [1, 1]} : vector<16x192xf32> to vector<16x16xf32>
    %cst_16 = arith.constant dense<0.000000e+00> : vector<16x16xf32>
    %34 = tpu.matmul %31, %32, %cst_16 {dimension_numbers = #tpu.dot_dimension_numbers<[1], [1], [0], [0], [0, 0, 1, 0], [], []>} : vector<16x16xf32>, vector<16x16xf32>, vector<16x16xf32> -> vector<16x16xf32>
    %cst_17 = arith.constant dense<0xFF800000> : vector<16xf32>
    %35 = vector.multi_reduction <maximumf>, %34, %cst_17 [1] : vector<16x16xf32> to vector<16xf32>
    %36 = vector.shape_cast %35 : vector<16xf32> to vector<16x1xf32>
    %37 = vector.broadcast %36 : vector<16x1xf32> to vector<16x16xf32>
    %38 = arith.subf %34, %37 : vector<16x16xf32>
    %39 = math.exp %38 : vector<16x16xf32>
    %cst_18 = arith.constant dense<0.000000e+00> : vector<16xf32>
    %40 = vector.multi_reduction <add>, %39, %cst_18 [1] : vector<16x16xf32> to vector<16xf32>
    %41 = vector.shape_cast %40 : vector<16xf32> to vector<16x1xf32>
    %42 = tpu.reciprocal %41 : vector<16x1xf32> -> vector<16x1xf32>
    %43 = vector.broadcast %42 : vector<16x1xf32> to vector<16x16xf32>
    %44 = arith.mulf %39, %43 : vector<16x16xf32>
    %cst_19 = arith.constant dense<0.000000e+00> : vector<16x16xf32>
    %45 = tpu.matmul %44, %33, %cst_19 {dimension_numbers = #tpu.dot_dimension_numbers<[1], [0], [0], [1], [0, 0, 1, 1], [], []>} : vector<16x16xf32>, vector<16x16xf32>, vector<16x16xf32> -> vector<16x16xf32>
    %46 = vector.extract_strided_slice %3 {offsets = [16, 0], sizes = [16, 64], strides = [1, 1]} : vector<64x64xf32> to vector<16x64xf32>
    %cst_20 = arith.constant dense<0.000000e+00> : vector<16x64xf32>
    %47 = tpu.matmul %45, %46, %cst_20 {dimension_numbers = #tpu.dot_dimension_numbers<[1], [0], [0], [1], [0, 0, 1, 1], [], []>} : vector<16x16xf32>, vector<16x64xf32>, vector<16x64xf32> -> vector<16x64xf32>
    %48 = arith.addf %28, %47 : vector<16x64xf32>
    %49 = vector.extract_strided_slice %7 {offsets = [0, 32], sizes = [16, 16], strides = [1, 1]} : vector<16x192xf32> to vector<16x16xf32>
    %cst_21 = arith.constant 2.500000e-01 : f32
    %50 = vector.broadcast %cst_21 : f32 to vector<16x16xf32>
    %51 = arith.mulf %49, %50 : vector<16x16xf32>
    %52 = vector.extract_strided_slice %7 {offsets = [0, 96], sizes = [16, 16], strides = [1, 1]} : vector<16x192xf32> to vector<16x16xf32>
    %53 = vector.extract_strided_slice %7 {offsets = [0, 160], sizes = [16, 16], strides = [1, 1]} : vector<16x192xf32> to vector<16x16xf32>
    %cst_22 = arith.constant dense<0.000000e+00> : vector<16x16xf32>
    %54 = tpu.matmul %51, %52, %cst_22 {dimension_numbers = #tpu.dot_dimension_numbers<[1], [1], [0], [0], [0, 0, 1, 0], [], []>} : vector<16x16xf32>, vector<16x16xf32>, vector<16x16xf32> -> vector<16x16xf32>
    %cst_23 = arith.constant dense<0xFF800000> : vector<16xf32>
    %55 = vector.multi_reduction <maximumf>, %54, %cst_23 [1] : vector<16x16xf32> to vector<16xf32>
    %56 = vector.shape_cast %55 : vector<16xf32> to vector<16x1xf32>
    %57 = vector.broadcast %56 : vector<16x1xf32> to vector<16x16xf32>
    %58 = arith.subf %54, %57 : vector<16x16xf32>
    %59 = math.exp %58 : vector<16x16xf32>
    %cst_24 = arith.constant dense<0.000000e+00> : vector<16xf32>
    %60 = vector.multi_reduction <add>, %59, %cst_24 [1] : vector<16x16xf32> to vector<16xf32>
    %61 = vector.shape_cast %60 : vector<16xf32> to vector<16x1xf32>
    %62 = tpu.reciprocal %61 : vector<16x1xf32> -> vector<16x1xf32>
    %63 = vector.broadcast %62 : vector<16x1xf32> to vector<16x16xf32>
    %64 = arith.mulf %59, %63 : vector<16x16xf32>
    %cst_25 = arith.constant dense<0.000000e+00> : vector<16x16xf32>
    %65 = tpu.matmul %64, %53, %cst_25 {dimension_numbers = #tpu.dot_dimension_numbers<[1], [0], [0], [1], [0, 0, 1, 1], [], []>} : vector<16x16xf32>, vector<16x16xf32>, vector<16x16xf32> -> vector<16x16xf32>
    %66 = vector.extract_strided_slice %3 {offsets = [32, 0], sizes = [16, 64], strides = [1, 1]} : vector<64x64xf32> to vector<16x64xf32>
    %cst_26 = arith.constant dense<0.000000e+00> : vector<16x64xf32>
    %67 = tpu.matmul %65, %66, %cst_26 {dimension_numbers = #tpu.dot_dimension_numbers<[1], [0], [0], [1], [0, 0, 1, 1], [], []>} : vector<16x16xf32>, vector<16x64xf32>, vector<16x64xf32> -> vector<16x64xf32>
    %68 = arith.addf %48, %67 : vector<16x64xf32>
    %69 = vector.extract_strided_slice %7 {offsets = [0, 48], sizes = [16, 16], strides = [1, 1]} : vector<16x192xf32> to vector<16x16xf32>
    %cst_27 = arith.constant 2.500000e-01 : f32
    %70 = vector.broadcast %cst_27 : f32 to vector<16x16xf32>
    %71 = arith.mulf %69, %70 : vector<16x16xf32>
    %72 = vector.extract_strided_slice %7 {offsets = [0, 112], sizes = [16, 16], strides = [1, 1]} : vector<16x192xf32> to vector<16x16xf32>
    %73 = vector.extract_strided_slice %7 {offsets = [0, 176], sizes = [16, 16], strides = [1, 1]} : vector<16x192xf32> to vector<16x16xf32>
    %cst_28 = arith.constant dense<0.000000e+00> : vector<16x16xf32>
    %74 = tpu.matmul %71, %72, %cst_28 {dimension_numbers = #tpu.dot_dimension_numbers<[1], [1], [0], [0], [0, 0, 1, 0], [], []>} : vector<16x16xf32>, vector<16x16xf32>, vector<16x16xf32> -> vector<16x16xf32>
    %cst_29 = arith.constant dense<0xFF800000> : vector<16xf32>
    %75 = vector.multi_reduction <maximumf>, %74, %cst_29 [1] : vector<16x16xf32> to vector<16xf32>
    %76 = vector.shape_cast %75 : vector<16xf32> to vector<16x1xf32>
    %77 = vector.broadcast %76 : vector<16x1xf32> to vector<16x16xf32>
    %78 = arith.subf %74, %77 : vector<16x16xf32>
    %79 = math.exp %78 : vector<16x16xf32>
    %cst_30 = arith.constant dense<0.000000e+00> : vector<16xf32>
    %80 = vector.multi_reduction <add>, %79, %cst_30 [1] : vector<16x16xf32> to vector<16xf32>
    %81 = vector.shape_cast %80 : vector<16xf32> to vector<16x1xf32>
    %82 = tpu.reciprocal %81 : vector<16x1xf32> -> vector<16x1xf32>
    %83 = vector.broadcast %82 : vector<16x1xf32> to vector<16x16xf32>
    %84 = arith.mulf %79, %83 : vector<16x16xf32>
    %cst_31 = arith.constant dense<0.000000e+00> : vector<16x16xf32>
    %85 = tpu.matmul %84, %73, %cst_31 {dimension_numbers = #tpu.dot_dimension_numbers<[1], [0], [0], [1], [0, 0, 1, 1], [], []>} : vector<16x16xf32>, vector<16x16xf32>, vector<16x16xf32> -> vector<16x16xf32>
    %86 = vector.extract_strided_slice %3 {offsets = [48, 0], sizes = [16, 64], strides = [1, 1]} : vector<64x64xf32> to vector<16x64xf32>
    %cst_32 = arith.constant dense<0.000000e+00> : vector<16x64xf32>
    %87 = tpu.matmul %85, %86, %cst_32 {dimension_numbers = #tpu.dot_dimension_numbers<[1], [0], [0], [1], [0, 0, 1, 1], [], []>} : vector<16x16xf32>, vector<16x64xf32>, vector<16x64xf32> -> vector<16x64xf32>
    %88 = arith.addf %68, %87 : vector<16x64xf32>
    %c0_33 = arith.constant 0 : index
    %c0_34 = arith.constant 0 : index
    %89 = vector.load %arg5[%c0_33, %c0_34] : memref<1x64xf32, #tpu.memory_space<vmem>>, vector<1x64xf32>
    %90 = vector.broadcast %89 : vector<1x64xf32> to vector<16x64xf32>
    %91 = arith.addf %88, %90 : vector<16x64xf32>
    %c0_35 = arith.constant 0 : index
    %c0_36 = arith.constant 0 : index
    %c0_37 = arith.constant 0 : index
    %92 = vector.load %arg6[%c0_35, %c0_36, %c0_37] : memref<1x16x64xf32, #tpu.memory_space<vmem>>, vector<1x16x64xf32>
    %93 = vector.shape_cast %92 : vector<1x16x64xf32> to vector<16x64xf32>
    %94 = vector.shape_cast %91 : vector<16x64xf32> to vector<1x16x64xf32>
    tpu.vector_store %arg6[%c0_35, %c0_36, %c0_37], %94 {strides = array<i32>} : memref<1x16x64xf32, #tpu.memory_space<vmem>>, vector<1x16x64xf32>,
    return
  }
  func.func @transform_0(%arg0: i32) -> (i32, i32, i32) {
    %c0_i32 = arith.constant 0 : i32
    %c0_i32_0 = arith.constant 0 : i32
    %c0_i32_1 = arith.constant 0 : i32
    return %arg0, %c0_i32, %c0_i32_0 : i32, i32, i32
  }
  func.func @transform_1(%arg0: i32) -> (i32, i32) {
    %c0_i32 = arith.constant 0 : i32
    %c0_i32_0 = arith.constant 0 : i32
    %c0_i32_1 = arith.constant 0 : i32
    return %c0_i32, %c0_i32_0 : i32, i32
  }
  func.func @transform_2(%arg0: i32) -> (i32, i32) {
    %c0_i32 = arith.constant 0 : i32
    %c0_i32_0 = arith.constant 0 : i32
    %c0_i32_1 = arith.constant 0 : i32
    return %c0_i32, %c0_i32_0 : i32, i32
  }
  func.func @transform_3(%arg0: i32) -> (i32, i32) {
    %c0_i32 = arith.constant 0 : i32
    %c0_i32_0 = arith.constant 0 : i32
    %c0_i32_1 = arith.constant 0 : i32
    return %c0_i32, %c0_i32_0 : i32, i32
  }
  func.func @transform_4(%arg0: i32) -> (i32, i32) {
    %c0_i32 = arith.constant 0 : i32
    %c0_i32_0 = arith.constant 0 : i32
    %c0_i32_1 = arith.constant 0 : i32
    return %c0_i32, %c0_i32_0 : i32, i32
  }
  func.func @transform_5(%arg0: i32) -> (i32, i32, i32) {
    %c0_i32 = arith.constant 0 : i32
    %c0_i32_0 = arith.constant 0 : i32
    %c0_i32_1 = arith.constant 0 : i32
    return %arg0, %c0_i32, %c0_i32_0 : i32, i32, i32
  }
}

</mosaic_0001>

<bundles_post_ra>
// kernel: attention_forward.1
= control target key start
LH: loop header
LB: loop body
LE: loop exit
PB: predicated region body
PF: predicated region fallthrough
CT: control target
= control target key end

     0   :  { %10 = vsyncpa [#allocation3], 0  ;;  %s2324_s0 = inlined_call_operand.vmem [shape: f32[2,16,64], index: 0, kind: input, shape index: {}]   ;;  %s2325_s1 = inlined_call_operand.vmem [shape: f32[64,192], index: 1, kind: input, shape index: {}]   ;;  %s2326_s2 = inlined_call_operand.vmem [shape: f32[1,192], index: 2, kind: input, shape index: {}]   ;;  %s2327_s3 = inlined_call_operand.vmem [shape: f32[64,64], index: 3, kind: input, shape index: {}]   ;;  %s2328_s4 = inlined_call_operand.vmem [shape: f32[1,64], index: 4, kind: input, shape index: {}]   ;;  %s2329_s5 = inlined_call_operand.hbm [shape: f32[2,16,64], index: 5, kind: output, shape index: {}]  }
   0x1   :  { %12 = vsyncpa [#allocation3 + $0x1], 0  ;;  %s2039_s18 = smov 0   ;;  %s2041_s19 = smov 0  }
   0x2   :  { %s2043_s20 = smov 0   ;;  %s2045_s21 = smov 0  }
   0x3 LB: > { %s2060_s22 = sadd.s32 4294967295, %s1996_s21   ;;  %s1559_s23 = sadd.s32 4294967294, %s1996_s21   ;;  %s1996_s21 = sphi %s2045_s21, %s2337_s21   ;;  %s1992_s20 = sphi %s2043_s20, %s2336_s20   ;;  %s1988_s19 = sphi %s2041_s19, %s2335_s19   ;;  %s1984_s18 = sphi %s2039_s18, %s2334_s18  }
   0x4   : > { %s2064_s24 = sadd.s32 1, %s1996_s21   ;;  %s135_s25 = sadd.s32 1, %s1992_s20 }
   0x5   : > { %s132_s26 = ssub.s32 %s1996_s21, %s2064_s24  ;;  %p145_p0 = scmp.ne.s32.totalorder %s1992_s20, %s1988_s19 }
   0x6   : > { %p133_p1 = scmp.eq.s32.totalorder %s132_s26, 0  ;;  %p146_p2 = scmp.eq.s32.totalorder %s2060_s22, 1 }
   0x7   : > { %p151_p3 = scmp.ne.s32.totalorder %s1988_s19, %s1984_s18  ;;  %p152_p4 = scmp.eq.s32.totalorder %s1559_s23, 1 }
   0x8   : > { %s2075_s27 = scalar_select %p133_p1, %s1992_s20, %s135_s25  }
   0x9   : > { %p2077_p5 = por %p146_p2, %p145_p0  ;;  %p2081_p6 = por %p152_p4, %p151_p3 }
   0xa   : > { %p1562_p7 = scmp.ge.s32.totalorder %s1996_s21, 1  ;;  %p190_p8 = scmp.lt.s32.totalorder %s1996_s21, 3 }
   0xc   : > { %p191_p9 = pnand %p1562_p7, %p190_p8 }
   0xd   : > { %v226_v0 = vld [vmem:[%s2325_s1 + $0x8] sm:$0xff] (!%p191_p9)  ;;  %v228_v1 = vld [vmem:[%s2325_s1 + $0x18] sm:$0xff] (!%p191_p9)  ;;  %v225_v2 = vld [vmem:[%s2325_s1] sm:$0xff] (!%p191_p9)  ;;  %v1998_v7 = vmov (!%p191_p9), 0.0   ;;  %p218_p10 = scmp.lt.s32.totalorder (!%p191_p9), %s2060_s22, 1  ;;  %vm261_vm0 = vcmask (!%p191_p9), 523264   ;;  %v251_v27 = vlaneseq (!%p191_p9) }
   0xe   : > { %194 = sbr.rel (%p191_p9) target bundleno = 2650 (0xa5a), region = 40  ;;  %v1740_v3 = vpack.c.bf16 (!%p191_p9), %v228_v1, %v226_v0  ;;  %v227_v4 = vld [vmem:[%s2325_s1 + $0x10] sm:$0xff] (!%p191_p9)  ;;  %v230_v5 = vld [vmem:[%s2325_s1 + $0x28] sm:$0xff] (!%p191_p9)  ;;  %v232_v6 = vld [vmem:[%s2325_s1 + $0x38] sm:$0xff] (!%p191_p9)  ;;  %332 = vmatprep.mubr.f32.mxu0 (!%p191_p9), %v1998_v7  ;;  %vm353_vm1 = vcmask (!%p191_p9), 130048   ;;  %s1999_s12 = smov (!%p191_p9), 64  }
   0xf   : > { %v1742_v8 = vpack.c.bf16 (!%p191_p9), %v227_v4, %v225_v2  ;;  %v1744_v9 = vpack.c.bf16 (!%p191_p9), %v232_v6, %v230_v5  ;;  %v229_v10 = vld [vmem:[%s2325_s1 + $0x20] sm:$0xff] (!%p191_p9)  ;;  %v231_v11 = vld [vmem:[%s2325_s1 + $0x30] sm:$0xff] (!%p191_p9)  ;;  %v234_v12 = vld [vmem:[%s2325_s1 + $0x48] sm:$0xff] (!%p191_p9)  ;;  %v252_v28 = vshrl.u32 (!%p191_p9), %v251_v27, 7  ;;  %s2000_s13 = smov (!%p191_p9), 48   ;;  %s2001_s14 = smov (!%p191_p9), 112  }
  0x10   : > { %1741 = vmatprep.subr.bf16.mxu0 (!%p191_p9), %v1740_v3  ;;  %v236_v13 = vld [vmem:[%s2325_s1 + $0x58] sm:$0xff] (!%p191_p9)  ;;  %v1746_v14 = vpack.c.bf16 (!%p191_p9), %v231_v11, %v229_v10  ;;  %v233_v16 = vld [vmem:[%s2325_s1 + $0x40] sm:$0xff] (!%p191_p9)  ;;  %v235_v17 = vld [vmem:[%s2325_s1 + $0x50] sm:$0xff] (!%p191_p9)  ;;  %s2002_s15 = smov (!%p191_p9), 96   ;;  %s2003_s16 = smov (!%p191_p9), 32  }
  0x11   : > { %1743 = vmatpush1.bf16.msra.mxu0 (!%p191_p9), %v1742_v8  ;;  %v1748_v15 = vpack.c.bf16 (!%p191_p9), %v236_v13, %v234_v12  ;;  %v238_v18 = vld [vmem:[%s2325_s1 + $0x68] sm:$0xff] (!%p191_p9)  ;;  %v240_v19 = vld [vmem:[%s2325_s1 + $0x78] sm:$0xff] (!%p191_p9)  ;;  %v1750_v20 = vpack.c.bf16 (!%p191_p9), %v235_v17, %v233_v16  ;;  %v237_v22 = vld [vmem:[%s2325_s1 + $0x60] sm:$0xff] (!%p191_p9)  ;;  %v253_v29 = vsub.s32 (!%p191_p9), 0, %v252_v28  ;;  %v257_v32 = vsub.s32 (!%p191_p9), 1, %v252_v28  ;;  %s2005_s23 = smov (!%p191_p9), 80  }
  0x12   : > { %1745 = vmatprep.subr.bf16.mxu0 (!%p191_p9), %v1744_v9  ;;  %v1752_v21 = vpack.c.bf16 (!%p191_p9), %v240_v19, %v238_v18  ;;  %v239_v23 = vld [vmem:[%s2325_s1 + $0x70] sm:$0xff] (!%p191_p9)  ;;  %v249_v30 = vld [vmem:[%s2326_s2] sm:$0x3] (!%p191_p9)  ;;  %vm2156_vm2 = vmpackc.low (!%p191_p9), %vm353_vm1, %vm353_vm1  ;;  %s215_s25 = sand.u32 (!%p191_p9), 1, %s1988_s19  }
  0x13   : > { %v1754_v24 = vpack.c.bf16 (!%p191_p9), %v239_v23, %v237_v22  ;;  %v254_v31 = vrot.slane (!%p191_p9), %v249_v30, %v253_v29  ;;  %v258_v36 = vrot.slane (!%p191_p9), %v249_v30, %v257_v32  ;;  %s1563_s26 = sshll.u32 (!%p191_p9), %s215_s25, 4 }
  0x14   : > { %s217_s7 = scalar_lea.vmem (!%p191_p9), [#allocation2], %s1563_s26 }
  0x15   : > { %s219_s17 = scalar_select %p218_p10, %s2060_s22, 1  ;;  %1747 = vmatpush1.bf16.msra.mxu0 %v1746_v14 }
  0x16   : > { %1749 = vmatprep.subr.bf16.mxu0 %v1748_v15  ;;  %s1497_s8 = sshll.u32 %s217_s7, 4  ;;  %s2274_s8 = int_to_ptr.vmem [resolvable:$true] %s1497_s8 }
  0x17   : > { %s1606_s6 = sshll.u32 %s219_s17, 4  ;;  %s2004_s17 = smov 16  }
  0x18   : > { %s222_s9 = scalar_lea.vmem %s2324_s0, %s1606_s6 }
  0x19   : > { %1751 = vmatpush1.bf16.msra.mxu0 %v1750_v20  ;;  %v223_v25 = vld [vmem:[%s222_s9] sm:$0xff]  ;;  %v224_v26 = vld [vmem:[%s222_s9 + $0x8] sm:$0xff]  ;;  %s1607_s9 = sshll.u32 %s2060_s22, 8  ;;  %s1934_s22 = scalar_lea.vmem %s2274_s8, 256 }
  0x1a   : > { %1753 = vmatprep.subr.bf16.mxu0 %v1752_v21  ;;  %p1935_p11 = scmp.ne.s32.totalorder %s2274_s8, %s1934_s22 }
  0x1c   : > { %p1936_p12 = pnand %p1935_p11, %p2077_p5 }
  0x1d   : > { %1755 = vmatpush1.bf16.msra.mxu0 %v1754_v24 }
  0x1e   : > { %p1937_p13 = pneg %p1936_p12 }
  0x20   : > { %1566 = vmatmul.mubr.msk.f32.vlgmr.msra.gmra.mrb[0].mxu0 %vm261_vm0, %v223_v25 }
  0x21   : > { %338 = vmatprep.mubr.f32.mxu0 %v1998_v7 }
  0x24   : > { %1567 = vmatmul.mubr.msk.f32.gmra.mrb[2].mxu0 %vm261_vm0, %v224_v26 }
  0xf3   : > { %v334_v33 = vpop.f32.mrb[0].mxu0 }
  0xf4   : > { %v335_v34 = vadd.f32 %v334_v33, %v254_v31  ;;  %v336_v35 = vpop.f32.mrb[1].mxu0 }
  0xf5   : > { %v337_v41 = vadd.f32 %v336_v35, %v258_v36  ;;  %v244_v35 = vld [vmem:[%s2327_s3 + $0x18] sm:$0xff] }
  0xf6   : > { %v2145_v37 = vmul.f32 0.25, %v335_v34 }
  0xf7   : > { %v340_v38 = vpop.f32.mrb[2].mxu0 }
  0xf8   : > { %v341_v39 = vadd.f32 %v340_v38, %v254_v31  ;;  %v342_v40 = vpop.f32.mrb[3].mxu0  ;;  %1660 = vmatprep.mubr.msk.f32.mxu1 %vm353_vm1, %v2145_v37 }
  0xf9   : > { %v343_v42 = vadd.f32 %v342_v40, %v258_v36 }
  0xfa   : > { %v2149_v43 = vpack.i.bf16 %v341_v39, %v335_v34  ;;  %v2164_v51 = vmul.f32 0.25, %v341_v39  ;;  %v243_v34 = vld [vmem:[%s2327_s3 + $0x10] sm:$0xff] }
  0xfb   : > { %v1762_v44 = vpack.c.bf16 %v343_v42, %v337_v41  ;;  %v2151_v45 = vpack.i.bf16 %v343_v42, %v337_v41  ;;  %v1776_v36 = vpack.c.bf16 %v244_v35, %v243_v34 }
  0xfc   : > { %1868 = vrot.lane.b32.xlu0 %v2149_v43, %s1999_s12  ;;  %s2279_s12 = scalar_lea.hbm %s2329_s5, %s1607_s9 }
 0x16e   : > { %v1869_v46 = vpop.permute.xlu0 %1868 }
 0x16f   : > { %v1871_v47 = vunpack.i.h.bf16 %v1869_v46  ;;  %v1870_v48 = vunpack.i.l.bf16 %v1869_v46 }
 0x171   : > { %v1756_v50 = vpack.c.bf16 %v1871_v47, %v1870_v48 }
 0x173   : > { %1758 = vmatprep.subr.msk.bf16.mxu1 %vm2156_vm2, %v1756_v50 }
 0x174   : > { %1761 = vmatpush3.bf16.xpose.msk.msra.mxu1 %vm2156_vm2, %v1756_v50 }
 0x175   : > { %1763 = vmatprep.subr.bf16.mxu1 %v1762_v44 }
 0x17b   : > { %1661 = vmatmul.mubr.msk.f32.vlgmr.msra.gmra.mrb[0].mxu1 %vm353_vm1, %v2164_v51 }
 0x17c   : > { %1765 = vmatpush3.bf16.msra.mxu1 %v1762_v44 }
 0x24e   : > { %v1662_v52 = vpop.f32.mrb[0].mxu1 }
 0x24f   : > { %v430_v53 = vpop.f32.mrb[1].mxu1  ;;  %v442_v54 = vsel %vm353_vm1, %v1662_v52, -inf }
 0x250   : > { %443 = vmax.xlane.f32.xlu1 %v442_v54  ;;  %v439_v55 = vsel %vm353_vm1, %v430_v53, -inf }
 0x251   : > { %440 = vmax.xlane.f32.xlu0 %v439_v55 }
 0x261   : > { %1873 = vrot.lane.b32.xlu1 %v2149_v43, %s2000_s13  ;;  %s2283_s13 = scalar_lea.sflag [#allocation3], %s215_s25 }
 0x265   : > { %542 = vrot.lane.b32.xlu1 %v2145_v37, %s2001_s14 }
 0x2dd   : > { %v444_v56 = vpop.xlane.xlu1 %443 }
 0x2de   : > { %v446_v57 = vsub.f32 %v1662_v52, %v444_v56  ;;  %v441_v58 = vpop.xlane.xlu0 %440 }
 0x2df   : > { %v445_v59 = vsub.f32 %v430_v53, %v441_v58  ;;  %v242_v58 = vld [vmem:[%s2327_s3 + $0x8] sm:$0xff] }
 0x2e0   : > { %v449_v60 = vmul.f32 1.442695, %v446_v57  ;;  %v241_v57 = vld [vmem:[%s2327_s3] sm:$0xff] }
 0x2e1   : > { %v447_v61 = vmul.f32 1.442695, %v445_v59  ;;  %v1874_v62 = vpop.permute.xlu1 %1873  ;;  %v1780_v59 = vpack.c.bf16 %v242_v58, %v241_v57 }
 0x2e2   : > { %1902 = vpow2.f32 %v449_v60  ;;  %v1876_v63 = vunpack.i.h.bf16 %v1874_v62  ;;  %v1875_v0 = vunpack.i.l.bf16 %v1874_v62 }
 0x2e3   : > { %1904 = vpow2.f32 %v447_v61 }
 0x2e4   : > { %v1766_v1 = vpack.c.bf16 %v1876_v63, %v1875_v0 }
 0x2e5   : > { %v543_v6 = vpop.permute.xlu1 %542 }
 0x2e6   : > { %1768 = vmatprep.subr.msk.bf16.mxu1 %vm2156_vm2, %v1766_v1 }
 0x2ec   : > { %v1903_v2 = vpop.eup %1902 }
 0x2ed   : > { %v454_v3 = vsel %vm353_vm1, %v1903_v2, 0.0  ;;  %v1905_v4 = vpop.eup %1904 }
 0x2ee   : > { %455 = vadd.xlane.f32.xlu1 %v454_v3  ;;  %v451_v5 = vsel %vm353_vm1, %v1905_v4, 0.0 }
 0x2f2   : > { %452 = vadd.xlane.f32.xlu1 %v451_v5 }
 0x303   : > { %544 = vrot.lane.b32.xlu1 %v2164_v51, %s2001_s14 }
 0x37b   : > { %v456_v7 = vpop.xlane.xlu1 %455 }
 0x37c   : > { %1906 = vrcp.f32 %v456_v7 }
 0x37f   : > { %v453_v8 = vpop.xlane.xlu1 %452 }
 0x380   : > { %1908 = vrcp.f32 %v453_v8 }
 0x383   : > { %v545_v13 = vpop.permute.xlu1 %544 }
 0x386   : > { %v1907_v9 = vpop.eup %1906 }
 0x387   : > { %v460_v12 = vmul.f32 %v1907_v9, %v1903_v2 }
 0x38a   : > { %v1909_v10 = vpop.eup %1908 }
 0x38b   : > { %v459_v11 = vmul.f32 %v1909_v10, %v1905_v4 }
 0x38d   : > { %1667 = vmatprep.mubr.msk.f32.mxu1 %vm353_vm1, %v459_v11 }
 0x38e   : > { %1668 = vmatmul.mubr.msk.f32.vlgmr.msra.gmra.mrb[2].mxu1 %vm353_vm1, %v460_v12 }
 0x38f   : > { %1771 = vmatpush3.bf16.xpose.msk.msra.mxu1 %vm2156_vm2, %v1766_v1  ;;  %1674 = vmatprep.mubr.msk.f32.mxu1 %vm353_vm1, %v543_v6 }
 0x390   : > { %1777 = vmatprep.subr.bf16.mxu1 %v1776_v36 }
 0x396   : > { %1675 = vmatmul.mubr.msk.f32.vlgmr.msra.gmra.mrb[4].mxu1 %vm353_vm1, %v545_v13 }
 0x397   : > { %1779 = vmatpush3.bf16.msra.mxu1 %v1776_v36 }
 0x398   : > { %1781 = vmatprep.subr.bf16.mxu1 %v1780_v59 }
 0x461   : > { %v2185_v14 = vpop.f32.mrb[2].mxu1 }
 0x462   : > { %v2187_v15 = vpop.f32.mrb[3].mxu1 }
 0x469   : > { %v1676_v16 = vpop.f32.mrb[4].mxu1 }
 0x46a   : > { %v624_v17 = vpop.f32.mrb[5].mxu1  ;;  %v636_v18 = vsel %vm353_vm1, %v1676_v16, -inf }
 0x46b   : > { %637 = vmax.xlane.f32.xlu1 %v636_v18  ;;  %v633_v19 = vsel %vm353_vm1, %v624_v17, -inf  ;;  %v245_v18 = vld [vmem:[%s2327_s3 + $0x20] sm:$0xff] }
 0x46c   : > { %634 = vmax.xlane.f32.xlu0 %v633_v19  ;;  %v246_v19 = vld [vmem:[%s2327_s3 + $0x28] sm:$0xff] }
 0x47c   : > { %908 = vrot.lane.b32.xlu1 %v2164_v51, %s2002_s15 }
 0x482   : > { %1878 = vrot.lane.b32.xlu0 %v2151_v45, %s2001_s14  ;;  %s2006_s14 = smov [#allocation2]  }
 0x4f8   : > { %v638_v20 = vpop.xlane.xlu1 %637 }
 0x4f9   : > { %v640_v21 = vsub.f32 %v1676_v16, %v638_v20  ;;  %v635_v22 = vpop.xlane.xlu0 %634  ;;  %v1794_v20 = vpack.c.bf16 %v246_v19, %v245_v18 }
 0x4fa   : > { %v639_v23 = vsub.f32 %v624_v17, %v635_v22 }
 0x4fb   : > { %v643_v24 = vmul.f32 1.442695, %v640_v21 }
 0x4fc   : > { %v641_v25 = vmul.f32 1.442695, %v639_v23  ;;  %v909_v54 = vpop.permute.xlu1 %908 }
 0x4fd   : > { %1910 = vpow2.f32 %v643_v24  ;;  %v1879_v26 = vpop.permute.xlu0 %1878 }
 0x4fe   : > { %v1881_v27 = vunpack.i.h.bf16 %v1879_v26  ;;  %v1880_v28 = vunpack.i.l.bf16 %v1879_v26  ;;  %1912 = vpow2.f32 %v641_v25 }
 0x500   : > { %v1772_v29 = vpack.c.bf16 %v1881_v27, %v1880_v28 }
 0x502   : > { %1773 = vmatprep.subr.bf16.mxu0 %v1772_v29 }
 0x503   : > { %1775 = vmatpush3.bf16.msra.mxu0 %v1772_v29 }
 0x507   : > { %v1911_v30 = vpop.eup %1910 }
 0x508   : > { %v648_v31 = vsel %vm353_vm1, %v1911_v30, 0.0  ;;  %v1913_v32 = vpop.eup %1912 }
 0x509   : > { %649 = vadd.xlane.f32.xlu0 %v648_v31  ;;  %v645_v33 = vsel %vm353_vm1, %v1913_v32, 0.0 }
 0x50d   : > { %646 = vadd.xlane.f32.xlu0 %v645_v33 }
 0x523   : > { %1883 = vrot.lane.b32.xlu0 %v2149_v43, %s2003_s16 }
 0x527   : > { %906 = vrot.lane.b32.xlu0 %v2145_v37, %s2002_s15 }
 0x52b   : > { %1888 = vrot.lane.b32.xlu0 %v2149_v43, %s2004_s17 }
 0x52f   : > { %1189 = vrot.lane.b32.xlu0 %v2145_v37, %s2005_s23 }
 0x533   : > { %1191 = vrot.lane.b32.xlu0 %v2164_v51, %s2005_s23 }
 0x596   : > { %v650_v38 = vpop.xlane.xlu0 %649 }
 0x597   : > { %1914 = vrcp.f32 %v650_v38 }
 0x59a   : > { %v647_v39 = vpop.xlane.xlu0 %646 }
 0x59b   : > { %1916 = vrcp.f32 %v647_v39 }
 0x59e   : > { %v1884_v40 = vpop.permute.xlu0 %1883 }
 0x59f   : > { %v1886_v37 = vunpack.i.h.bf16 %v1884_v40  ;;  %v1885_v41 = vunpack.i.l.bf16 %v1884_v40 }
 0x5a1   : > { %v1784_v42 = vpack.c.bf16 %v1886_v37, %v1885_v41  ;;  %v1915_v44 = vpop.eup %1914 }
 0x5a2   : > { %v907_v43 = vpop.permute.xlu0 %906  ;;  %v654_v50 = vmul.f32 %v1915_v44, %v1911_v30  ;;  %v248_v44 = vld [vmem:[%s2327_s3 + $0x38] sm:$0xff] }
 0x5a3   : > { %1786 = vmatprep.subr.msk.bf16.mxu0 %vm2156_vm2, %v1784_v42 }
 0x5a5   : > { %v1917_v46 = vpop.eup %1916 }
 0x5a6   : > { %v1889_v47 = vpop.permute.xlu0 %1888  ;;  %v653_v48 = vmul.f32 %v1917_v46, %v1913_v32 }
 0x5a7   : > { %v1891_v51 = vunpack.i.h.bf16 %v1889_v47  ;;  %v1890_v52 = vunpack.i.l.bf16 %v1889_v47 }
 0x5a8   : > { %1681 = vmatprep.mubr.msk.f32.mxu0 %vm353_vm1, %v653_v48 }
 0x5a9   : > { %v1798_v53 = vpack.c.bf16 %v1891_v51, %v1890_v52  ;;  %1682 = vmatmul.mubr.msk.f32.vlgmr.msra.gmra.mrb[4].mxu0 %vm353_vm1, %v654_v50 }
 0x5aa   : > { %1789 = vmatpush3.bf16.xpose.msk.msra.mxu0 %vm2156_vm2, %v1784_v42  ;;  %1702 = vmatprep.mubr.msk.f32.mxu0 %vm353_vm1, %v907_v43  ;;  %v1190_v55 = vpop.permute.xlu0 %1189  ;;  %v247_v43 = vld [vmem:[%s2327_s3 + $0x30] sm:$0xff] }
 0x5ab   : > { %1800 = vmatprep.subr.msk.bf16.mxu0 %vm2156_vm2, %v1798_v53  ;;  %v1808_v50 = vpack.c.bf16 %v248_v44, %v247_v43 }
 0x5ae   : > { %v1192_v56 = vpop.permute.xlu0 %1191 }
 0x5b1   : > { %1703 = vmatmul.mubr.msk.f32.vlgmr.msra.gmra.mrb[6].mxu0 %vm353_vm1, %v909_v54 }
 0x5b2   : > { %1803 = vmatpush3.bf16.xpose.msk.msra.mxu0 %vm2156_vm2, %v1798_v53  ;;  %1723 = vmatprep.mubr.msk.f32.mxu0 %vm353_vm1, %v1190_v55 }
 0x5b9   : > { %1724 = vmatmul.mubr.msk.f32.vlgmr.msra.gmra.mrb[8].mxu0 %vm353_vm1, %v1192_v56  ;;  %v1600_v56 = vld [vmem:[%s2328_s4] ss:$0 sm:$0xff] }
 0x67c   : > { %v1683_v60 = vpop.f32.mrb[4].mxu0 }
 0x67d   : > { %v735_v61 = vpop.f32.mrb[5].mxu0 }
 0x67e   : > { %1688 = vmatprep.mubr.msk.f32.mxu1 %vm353_vm1, %v735_v61 }
 0x67f   : > { %1689 = vmatmul.mubr.msk.f32.vlgmr.msra.gmra.mrb[6].mxu1 %vm353_vm1, %v1683_v60 }
 0x680   : > { %1695 = vmatprep.mubr.msk.f32.mxu1 %vm353_vm1, %v2187_v15  ;;  %1783 = vmatpush3.bf16.msra.mxu1 %v1780_v59 }
 0x684   : > { %v1704_v49 = vpop.f32.mrb[6].mxu0 }
 0x685   : > { %v988_v62 = vpop.f32.mrb[7].mxu0  ;;  %v1000_v63 = vsel %vm353_vm1, %v1704_v49, -inf }
 0x686   : > { %1001 = vmax.xlane.f32.xlu1 %v1000_v63  ;;  %v997_v0 = vsel %vm353_vm1, %v988_v62, -inf }
 0x687   : > { %998 = vmax.xlane.f32.xlu0 %v997_v0  ;;  %1696 = vmatmul.mubr.msk.f32.vlgmr.msra.gmra.mrb[6].mxu1 %vm353_vm1, %v2185_v14 }
 0x68c   : > { %v1725_v1 = vpop.f32.mrb[8].mxu0 }
 0x68d   : > { %v1271_v2 = vpop.f32.mrb[9].mxu0  ;;  %v1283_v17 = vsel %vm353_vm1, %v1725_v1, -inf }
 0x68e   : > { %v1280_v16 = vsel %vm353_vm1, %v1271_v2, -inf }
 0x697   : > { %1893 = vrot.lane.b32.xlu1 %v2151_v45, %s2002_s15  ;;  %s1938_s15 = sshll.u32 %s2006_s14, 4  ;;  %s1939_s15 = int_to_ptr.vmem [resolvable:$false] %s1938_s15 }
 0x698   : > { %s1940_s16 = scalar_lea.vmem %s1939_s15, 512  ;;  %p1941_p0 = scmp.lt.s32.totalorder %s2274_s8, %s1939_s15 }
 0x699   : > { %p1942_p1 = scmp.lt.s32.totalorder %s1940_s16, %s1934_s22 }
 0x69b   : > { %1898 = vrot.lane.b32.xlu1 %v2151_v45, %s2005_s23  ;;  %p1943_p2 = por %p1942_p1, %p1941_p0 }
 0x69d   : > { %p1944_p3 = pnand %p1943_p2, %p1937_p13 }
 0x713   : > { %v1002_v3 = vpop.xlane.xlu1 %1001 }
 0x714   : > { %v1004_v4 = vsub.f32 %v1704_v49, %v1002_v3  ;;  %v999_v5 = vpop.xlane.xlu0 %998 }
 0x715   : > { %v1003_v6 = vsub.f32 %v988_v62, %v999_v5 }
 0x716   : > { %v1007_v7 = vmul.f32 1.442695, %v1004_v4 }
 0x717   : > { %v1005_v8 = vmul.f32 1.442695, %v1003_v6  ;;  %v1894_v9 = vpop.permute.xlu1 %1893 }
 0x718   : > { %v1896_v10 = vunpack.i.h.bf16 %v1894_v9  ;;  %v1895_v11 = vunpack.i.l.bf16 %v1894_v9 }
 0x719   : > { %1918 = vpow2.f32 %v1005_v8 }
 0x71a   : > { %v1790_v12 = vpack.c.bf16 %v1896_v10, %v1895_v11  ;;  %1920 = vpow2.f32 %v1007_v7 }
 0x71b   : > { %v1899_v26 = vpop.permute.xlu1 %1898 }
 0x71c   : > { %1791 = vmatprep.subr.bf16.mxu1 %v1790_v12  ;;  %v1901_v31 = vunpack.i.h.bf16 %v1899_v26  ;;  %v1900_v32 = vunpack.i.l.bf16 %v1899_v26 }
 0x71d   : > { %1793 = vmatpush3.bf16.msra.mxu1 %v1790_v12 }
 0x71e   : > { %1795 = vmatprep.subr.bf16.mxu1 %v1794_v20  ;;  %v1804_v36 = vpack.c.bf16 %v1901_v31, %v1900_v32 }
 0x723   : > { %v1919_v13 = vpop.eup %1918 }
 0x724   : > { %v1009_v14 = vsel %vm353_vm1, %v1919_v13, 0.0  ;;  %v1921_v15 = vpop.eup %1920 }
 0x725   : > { %1010 = vadd.xlane.f32.xlu0 %v1009_v14  ;;  %v1012_v45 = vsel %vm353_vm1, %v1921_v15, 0.0 }
 0x729   : > { %1013 = vadd.xlane.f32.xlu0 %v1012_v45 }
 0x72d   : > { %1281 = vmax.xlane.f32.xlu0 %v1280_v16 }
 0x731   : > { %1284 = vmax.xlane.f32.xlu0 %v1283_v17 }
 0x7b2   : > { %v1011_v21 = vpop.xlane.xlu0 %1010 }
 0x7b3   : > { %1922 = vrcp.f32 %v1011_v21 }
 0x7b6   : > { %v1014_v22 = vpop.xlane.xlu0 %1013 }
 0x7b7   : > { %1924 = vrcp.f32 %v1014_v22 }
 0x7ba   : > { %v1282_v23 = vpop.xlane.xlu0 %1281 }
 0x7bb   : > { %v1286_v24 = vsub.f32 %v1271_v2, %v1282_v23 }
 0x7bd   : > { %v1923_v25 = vpop.eup %1922  ;;  %v1288_v27 = vmul.f32 1.442695, %v1286_v24 }
 0x7be   : > { %v1285_v28 = vpop.xlane.xlu0 %1284  ;;  %v1017_v29 = vmul.f32 %v1923_v25, %v1919_v13 }
 0x7bf   : > { %1926 = vpow2.f32 %v1288_v27  ;;  %v1287_v30 = vsub.f32 %v1725_v1, %v1285_v28 }
 0x7c0   : > { %1709 = vmatprep.mubr.msk.f32.mxu1 %vm353_vm1, %v1017_v29 }
 0x7c1   : > { %v1925_v33 = vpop.eup %1924  ;;  %v1290_v34 = vmul.f32 1.442695, %v1287_v30 }
 0x7c2   : > { %v1018_v35 = vmul.f32 %v1925_v33, %v1921_v15 }
 0x7c3   : > { %1928 = vpow2.f32 %v1290_v34 }
 0x7c4   : > { %1710 = vmatmul.mubr.msk.f32.vlgmr.msra.gmra.mrb[8].mxu1 %vm353_vm1, %v1018_v35 }
 0x7c5   : > { %1797 = vmatpush3.bf16.msra.mxu1 %v1794_v20 }
 0x7c6   : > { %1805 = vmatprep.subr.bf16.mxu1 %v1804_v36 }
 0x7c9   : > { %v1927_v38 = vpop.eup %1926 }
 0x7ca   : > { %v1292_v39 = vsel %vm353_vm1, %v1927_v38, 0.0 }
 0x7cb   : > { %1293 = vadd.xlane.f32.xlu0 %v1292_v39 }
 0x7cd   : > { %v1929_v40 = vpop.eup %1928 }
 0x7ce   : > { %v1295_v37 = vsel %vm353_vm1, %v1929_v40, 0.0 }
 0x7cf   : > { %1296 = vadd.xlane.f32.xlu0 %v1295_v37 }
 0x858   : > { %v1294_v41 = vpop.xlane.xlu0 %1293 }
 0x859   : > { %1930 = vrcp.f32 %v1294_v41 }
 0x85c   : > { %v1297_v42 = vpop.xlane.xlu0 %1296 }
 0x85d   : > { %1932 = vrcp.f32 %v1297_v42 }
 0x863   : > { %v1931_v46 = vpop.eup %1930 }
 0x864   : > { %v1300_v52 = vmul.f32 %v1931_v46, %v1927_v38 }
 0x867   : > { %v1933_v51 = vpop.eup %1932 }
 0x868   : > { %v1301_v53 = vmul.f32 %v1933_v51, %v1929_v40 }
 0x897   : > { %v1711_v47 = vpop.f32.mrb[8].mxu1 }
 0x898   : > { %v1097_v48 = vpop.f32.mrb[9].mxu1 }
 0x899   : > { %1716 = vmatprep.mubr.msk.f32.mxu1 %vm353_vm1, %v1097_v48 }
 0x89a   : > { %1717 = vmatmul.mubr.msk.f32.vlgmr.msra.gmra.mrb[6].mxu1 %vm353_vm1, %v1711_v47 }
 0x89b   : > { %1807 = vmatpush3.bf16.msra.mxu1 %v1804_v36  ;;  %1730 = vmatprep.mubr.msk.f32.mxu1 %vm353_vm1, %v1300_v52 }
 0x89c   : > { %1809 = vmatprep.subr.bf16.mxu1 %v1808_v50 }
 0x89e   : > { %1731 = vmatmul.mubr.msk.f32.vlgmr.msra.gmra.mrb[10].mxu1 %vm353_vm1, %v1301_v53 }
 0x89f   : > { %1811 = vmatpush3.bf16.msra.mxu1 %v1808_v50 }
 0x971   : > { %v1732_v54 = vpop.f32.mrb[10].mxu1 }
 0x972   : > { %v1380_v55 = vpop.f32.mrb[11].mxu1 }
 0x973   : > { %1737 = vmatprep.mubr.msk.f32.mxu1 %vm353_vm1, %v1380_v55 }
 0x974   : > { %1738 = vmatmul.mubr.msk.f32.vlgmr.msra.gmra.mrb[6].mxu1 %vm353_vm1, %v1732_v54 }
 0xa47   : > { %v1739_v57 = vpop.f32.mrb[6].mxu1 }
 0xa48   : > { %v1480_v58 = vadd.f32 %v1739_v57, %v1600_v56  ;;  %v1461_v59 = vpop.f32.mrb[7].mxu1 }
 0xa49   : > { %v1479_v60 = vadd.f32 %v1600_v56, %v1461_v59 }
 0xa4a   : > { %1482 = vst.msk [vmem:[%s217_s7 + $0x8] sm:$0xff] %vm261_vm0, %v1480_v58 }
 0xa4b   : > { %1481 = vst.msk [vmem:[%s217_s7] sm:$0xff] %vm261_vm0, %v1479_v60 }
 0xa4c   : > { %1947 = shalt.err (!%p1944_p3)
}
 0xa4d   : > { %s1948_s17 = scalar_lea.hbm %s2279_s12, 256  ;;  %s1952_s26 = scalar_lea.hbm %s2329_s5, 512 }
 0xa4e   : > { %p1949_p4 = scmp.ne.s32.totalorder %s2279_s12, %s1948_s17  ;;  %p1953_p9 = scmp.lt.u32.totalorder %s2279_s12, %s2329_s5 }
 0xa4f   : > { %p1954_p10 = scmp.lt.u32.totalorder %s1952_s26, %s1948_s17  ;;  %p1956_p12 = scmp.lt.u32.totalorder %s1948_s17, %s2279_s12 }
 0xa50   : > { %p1950_p7 = pnand %p1949_p4, %p2077_p5 }
 0xa51   : > { %p1955_p11 = por %p1954_p10, %p1953_p9 }
 0xa52   : > { %p1951_p8 = pneg %p1950_p7 }
 0xa53   : > { %p1957_p13 = por %p1956_p12, %p1955_p11 }
 0xa55   : > { %p1958_p0 = pnand %p1957_p13, %p1951_p8 }
 0xa57   : > { %1961 = shalt.err (!%p1958_p0)
}
 0xa58   : > { %s2007_s7 = smov 128   ;;  %s2008_s9 = smov 8  }
 0xa59   : > { %1818 = dma.vmem_to_hbm [thread:$0]  (%p2077_p5), %s2274_s8, 256, %s2279_s12, %s2283_s13, %s2007_s7, %s2007_s7, %s2008_s9  }
 0xa5a PF: > { %p1824_p1 = scmp.ge.s32.totalorder %s1996_s21, 2  ;;  %s1512_s10 = sand.u32 1, %s1984_s18  }
 0xa5b   : > { %s1513_s11 = scalar_lea.sflag [#allocation3], %s1512_s10 }
 0xa5c   : > { %p1821_p2 = pnand %p1824_p1, %p2081_p6 }
 0xa5e   : > { %1979 = dma.done.wait (!%p1821_p2), %s1513_s11, 256  }
 0xa5f   : > { %1981 = vsyncadd (!%p1821_p2), %s1513_s11, 4294967040  ;;  %p15_p3 = scmp.ge.s32.totalorder %s2064_s24, 4   ;;  %s2334_s18 = smov %s1988_s19 }
 0xa60   : > { %s2335_s19 = smov %s1992_s20  ;;  %s2336_s20 = smov %s2075_s27 }
 0xa61   : > { %s2337_s21 = smov %s2064_s24  ;;  %17 = sbr.rel (!%p15_p3) target bundleno = 3 (0x3), region = 75 }
 0xa68   :  { %1518 = vsyncpa [#allocation3], 1 }
 0xa69   :  { %1520 = vsyncpa [#allocation3 + $0x1], 1 }

</bundles_post_ra>
